<compile_context>
chip_gen: v6e
topology: v6e:2x2x1
jax: 0.10.0
libtpu: 0.0.40
codegen_flags: <defaults>
</compile_context>

<pallas_src>
import jax
import jax.numpy as jnp
from jax.experimental import pallas as pl
from jax.experimental.pallas import tpu as pltpu


# ---------------------------------------------------------------------------
# Pallas kernel
# ---------------------------------------------------------------------------
def _kd_feat_kernel(fs_ref, ft_ref, out_ref, ss_s_ref, ss_t_ref):
    c = pl.program_id(1)

    @pl.when(c == 0)
    def _():
        ss_s_ref[...] = jnp.zeros_like(ss_s_ref)
        ss_t_ref[...] = jnp.zeros_like(ss_t_ref)

    fs = fs_ref[...].astype(jnp.float32)                       # (1, TC, P)
    ft = ft_ref[...].astype(jnp.float32)
    ss_s_ref[...] += jnp.sum(fs * fs, axis=1)                  # (1, P) sum of squares
    ss_t_ref[...] += jnp.sum(ft * ft, axis=1)

    @pl.when(c == pl.num_programs(1) - 1)
    def _():
        def spatial_softmax(x):                                # softmax over pixels (lanes)
            m = jnp.max(x, axis=-1, keepdims=True)
            e = jnp.exp(x - m)
            return e / jnp.sum(e, axis=-1, keepdims=True)

        d = spatial_softmax(ss_s_ref[...]) - spatial_softmax(ss_t_ref[...])   # (1, P)
        out_ref[...] = jnp.sum(d * d, axis=-1, keepdims=True).reshape(1, 1, 1)


def _pick_channel_tile(cf, p, target_bytes=2 * 1024 * 1024):
    """Largest channel tile (full Cf, or a multiple of 8 dividing Cf) within target_bytes."""
    if cf * p * 4 <= target_bytes:
        return cf
    best = None
    tc = 8
    while tc < cf:
        if cf % tc == 0 and tc * p * 4 <= target_bytes:
            best = tc
        tc += 8
    if best is not None:
        return best
    return 8 if cf % 8 == 0 else cf


# ---------------------------------------------------------------------------
# Glue: bilinear resize (matches torch F.interpolate mode='bilinear', align_corners=True)
# TODO(synk): resize runs as plain-JAX gather+lerp, not fused into the Pallas kernel.
# ---------------------------------------------------------------------------
def _bilinear_align_corners_nchw(x, out_h, out_w):
    _, _, h_in, w_in = x.shape
    x = x.astype(jnp.float32)

    def src_coords(out_size, in_size):
        if out_size == 1:
            return jnp.zeros((1,), jnp.float32)
        return jnp.arange(out_size, dtype=jnp.float32) * ((in_size - 1) / (out_size - 1))

    ys = src_coords(out_h, h_in)
    xs = src_coords(out_w, w_in)
    y0 = jnp.floor(ys).astype(jnp.int32)
    x0 = jnp.floor(xs).astype(jnp.int32)
    y1 = jnp.minimum(y0 + 1, h_in - 1)
    x1 = jnp.minimum(x0 + 1, w_in - 1)
    wy = (ys - y0.astype(jnp.float32))[None, None, :, None]
    wx = (xs - x0.astype(jnp.float32))[None, None, None, :]

    top = x[:, :, y0, :] * (1.0 - wy) + x[:, :, y1, :] * wy    # (B, C, out_h, W_in)
    out = top[:, :, :, x0] * (1.0 - wx) + top[:, :, :, x1] * wx
    return out


# ---------------------------------------------------------------------------
# Module forward: KDFeat
# ---------------------------------------------------------------------------
def kd_feat_loss(f_s, f_t):
    if f_s.shape != f_t.shape:
        f_t = _bilinear_align_corners_nchw(f_t, f_s.shape[-2], f_s.shape[-1])

    B, Cf, H, W = f_s.shape
    P = H * W
    fs = f_s.reshape(B, Cf, P)     # free reshape, no transpose: pixels on the lane axis
    ft = f_t.reshape(B, Cf, P)
    TC = _pick_channel_tile(Cf, P)

    per_batch = pl.pallas_call(
        _kd_feat_kernel,
        out_shape=jax.ShapeDtypeStruct((B, 1, 1), jnp.float32),
        grid_spec=pltpu.PrefetchScalarGridSpec(
            num_scalar_prefetch=0,
            grid=(B, Cf // TC),
            in_specs=[pl.BlockSpec((1, TC, P), lambda b, c: (b, c, 0)),
                      pl.BlockSpec((1, TC, P), lambda b, c: (b, c, 0))],
            out_specs=pl.BlockSpec((1, 1, 1), lambda b, c: (b, 0, 0)),
            scratch_shapes=[pltpu.VMEM((1, P), jnp.float32),
                            pltpu.VMEM((1, P), jnp.float32)],
        ),
        compiler_params=pltpu.CompilerParams(
            dimension_semantics=("parallel", "arbitrary"),
            vmem_limit_bytes=48 * 1024 * 1024),
    )(fs, ft)

    # MSELoss(reduction='mean') over B * 1 * H * W elements.
    return jnp.sum(per_batch) / float(B * P)


# ---------------------------------------------------------------------------
# Test
# ---------------------------------------------------------------------------
if __name__ == "__main__":
    key = jax.random.PRNGKey(0)
    k1, k2, k3 = jax.random.split(key, 3)

    B, Cf, Hf, Wf = 2, 4, 16, 16
    f_s = jax.random.normal(k1, (B, Cf, Hf, Wf), jnp.float32)
    f_t = jax.random.normal(k2, (B, Cf, Hf, Wf), jnp.float32)

    loss = kd_feat_loss(f_s, f_t)
    jax.block_until_ready(loss)

    # Pure-JAX reference (same-shape path).
    def ref_loss(a, b):
        def prep(x):
            s = jnp.sum(x * x, axis=1, keepdims=True)          # (B,1,H,W)
            s = s.reshape(s.shape[0], 1, -1)
            return jax.nn.softmax(s, axis=-1)
        pa, pb = prep(a), prep(b)
        return jnp.mean((pa - pb) ** 2)

    ref = ref_loss(f_s, f_t)
    assert jnp.allclose(loss, ref, rtol=1e-5, atol=1e-6), (float(loss), float(ref))

    # Exercise the mismatched-size path (bilinear align_corners=True resize of f_T).
    f_t_small = jax.random.normal(k3, (B, Cf, 8, 8), jnp.float32)
    loss2 = kd_feat_loss(f_s, f_t_small)
    jax.block_until_ready(loss2)
    assert bool(jnp.isfinite(loss2))

    print("KERNEL_OK")
</pallas_src>

<mosaic_0001>
module attributes {stable_mosaic.version = 11 : i64} {
  func.func @_kd_feat_kernel(%arg0: i32, %arg1: i32, %arg2: memref<1x4x256xf32, #tpu.memory_space<vmem>>, %arg3: memref<1x4x256xf32, #tpu.memory_space<vmem>>, %arg4: memref<1x1x1xf32, #tpu.memory_space<vmem>>, %arg5: memref<1x256xf32, #tpu.memory_space<vmem>>, %arg6: memref<1x256xf32, #tpu.memory_space<vmem>>) attributes {dimension_semantics = [#tpu.dimension_semantics<parallel>, #tpu.dimension_semantics<arbitrary>], iteration_bounds = array<i64: 2, 1>, scalar_prefetch = 0 : i64, scratch_operands = 2 : i64, tpu.core_type = #tpu.core_type<tc>, window_params = [{transform_indices = @transform_0, window_bounds = array<i64: 1, 4, 256>}, {transform_indices = @transform_1, window_bounds = array<i64: 1, 4, 256>}, {transform_indices = @transform_2, window_bounds = array<i64: 1, 1, 1>}]} {
    %c0_i32 = arith.constant 0 : i32
    %0 = arith.cmpi eq, %arg1, %c0_i32 : i32
    %1 = arith.extui %0 : i1 to i32
    %c0_i32_0 = arith.constant 0 : i32
    %2 = arith.cmpi ne, %1, %c0_i32_0 : i32
    scf.if %2 {
      %cst_17 = arith.constant 0.000000e+00 : f32
      %18 = vector.broadcast %cst_17 : f32 to vector<1x256xf32>
      %c0_18 = arith.constant 0 : index
      %c0_19 = arith.constant 0 : index
      %19 = vector.load %arg5[%c0_18, %c0_19] : memref<1x256xf32, #tpu.memory_space<vmem>>, vector<1x256xf32>
      tpu.vector_store %arg5[%c0_18, %c0_19], %18 {strides = array<i32>} : memref<1x256xf32, #tpu.memory_space<vmem>>, vector<1x256xf32>,
      %cst_20 = arith.constant 0.000000e+00 : f32
      %20 = vector.broadcast %cst_20 : f32 to vector<1x256xf32>
      %c0_21 = arith.constant 0 : index
      %c0_22 = arith.constant 0 : index
      %21 = vector.load %arg6[%c0_21, %c0_22] : memref<1x256xf32, #tpu.memory_space<vmem>>, vector<1x256xf32>
      tpu.vector_store %arg6[%c0_21, %c0_22], %20 {strides = array<i32>} : memref<1x256xf32, #tpu.memory_space<vmem>>, vector<1x256xf32>,
    } else {
    }
    %c0 = arith.constant 0 : index
    %c0_1 = arith.constant 0 : index
    %c0_2 = arith.constant 0 : index
    %3 = vector.load %arg2[%c0, %c0_1, %c0_2] : memref<1x4x256xf32, #tpu.memory_space<vmem>>, vector<1x4x256xf32>
    %c0_3 = arith.constant 0 : index
    %c0_4 = arith.constant 0 : index
    %c0_5 = arith.constant 0 : index
    %4 = vector.load %arg3[%c0_3, %c0_4, %c0_5] : memref<1x4x256xf32, #tpu.memory_space<vmem>>, vector<1x4x256xf32>
    %c0_6 = arith.constant 0 : index
    %c0_7 = arith.constant 0 : index
    %5 = vector.load %arg5[%c0_6, %c0_7] : memref<1x256xf32, #tpu.memory_space<vmem>>, vector<1x256xf32>
    %6 = arith.mulf %3, %3 : vector<1x4x256xf32>
    %cst = arith.constant dense<0.000000e+00> : vector<1x256xf32>
    %7 = vector.multi_reduction <add>, %6, %cst [1] : vector<1x4x256xf32> to vector<1x256xf32>
    %8 = arith.addf %5, %7 : vector<1x256xf32>
    %c0_8 = arith.constant 0 : index
    %c0_9 = arith.constant 0 : index
    %9 = vector.load %arg5[%c0_8, %c0_9] : memref<1x256xf32, #tpu.memory_space<vmem>>, vector<1x256xf32>
    tpu.vector_store %arg5[%c0_8, %c0_9], %8 {strides = array<i32>} : memref<1x256xf32, #tpu.memory_space<vmem>>, vector<1x256xf32>,
    %c0_10 = arith.constant 0 : index
    %c0_11 = arith.constant 0 : index
    %10 = vector.load %arg6[%c0_10, %c0_11] : memref<1x256xf32, #tpu.memory_space<vmem>>, vector<1x256xf32>
    %11 = arith.mulf %4, %4 : vector<1x4x256xf32>
    %cst_12 = arith.constant dense<0.000000e+00> : vector<1x256xf32>
    %12 = vector.multi_reduction <add>, %11, %cst_12 [1] : vector<1x4x256xf32> to vector<1x256xf32>
    %13 = arith.addf %10, %12 : vector<1x256xf32>
    %c0_13 = arith.constant 0 : index
    %c0_14 = arith.constant 0 : index
    %14 = vector.load %arg6[%c0_13, %c0_14] : memref<1x256xf32, #tpu.memory_space<vmem>>, vector<1x256xf32>
    tpu.vector_store %arg6[%c0_13, %c0_14], %13 {strides = array<i32>} : memref<1x256xf32, #tpu.memory_space<vmem>>, vector<1x256xf32>,
    %c0_i32_15 = arith.constant 0 : i32
    %15 = arith.cmpi eq, %arg1, %c0_i32_15 : i32
    %16 = arith.extui %15 : i1 to i32
    %c0_i32_16 = arith.constant 0 : i32
    %17 = arith.cmpi ne, %16, %c0_i32_16 : i32
    scf.if %17 {
      %c0_17 = arith.constant 0 : index
      %c0_18 = arith.constant 0 : index
      %18 = vector.load %arg5[%c0_17, %c0_18] : memref<1x256xf32, #tpu.memory_space<vmem>>, vector<1x256xf32>
      %cst_19 = arith.constant dense<0xFF800000> : vector<1xf32>
      %19 = vector.multi_reduction <maximumf>, %18, %cst_19 [1] : vector<1x256xf32> to vector<1xf32>
      %20 = vector.shape_cast %19 : vector<1xf32> to vector<1x1xf32>
      %21 = vector.broadcast %20 : vector<1x1xf32> to vector<1x256xf32>
      %22 = arith.subf %18, %21 : vector<1x256xf32>
      %23 = math.exp %22 : vector<1x256xf32>
      %cst_20 = arith.constant dense<0.000000e+00> : vector<1xf32>
      %24 = vector.multi_reduction <add>, %23, %cst_20 [1] : vector<1x256xf32> to vector<1xf32>
      %25 = vector.shape_cast %24 : vector<1xf32> to vector<1x1xf32>
      %26 = vector.broadcast %25 : vector<1x1xf32> to vector<1x256xf32>
      %27 = arith.divf %23, %26 : vector<1x256xf32>
      %c0_21 = arith.constant 0 : index
      %c0_22 = arith.constant 0 : index
      %28 = vector.load %arg6[%c0_21, %c0_22] : memref<1x256xf32, #tpu.memory_space<vmem>>, vector<1x256xf32>
      %cst_23 = arith.constant dense<0xFF800000> : vector<1xf32>
      %29 = vector.multi_reduction <maximumf>, %28, %cst_23 [1] : vector<1x256xf32> to vector<1xf32>
      %30 = vector.shape_cast %29 : vector<1xf32> to vector<1x1xf32>
      %31 = vector.broadcast %30 : vector<1x1xf32> to vector<1x256xf32>
      %32 = arith.subf %28, %31 : vector<1x256xf32>
      %33 = math.exp %32 : vector<1x256xf32>
      %cst_24 = arith.constant dense<0.000000e+00> : vector<1xf32>
      %34 = vector.multi_reduction <add>, %33, %cst_24 [1] : vector<1x256xf32> to vector<1xf32>
      %35 = vector.shape_cast %34 : vector<1xf32> to vector<1x1xf32>
      %36 = vector.broadcast %35 : vector<1x1xf32> to vector<1x256xf32>
      %37 = arith.divf %33, %36 : vector<1x256xf32>
      %38 = arith.subf %27, %37 : vector<1x256xf32>
      %39 = arith.mulf %38, %38 : vector<1x256xf32>
      %cst_25 = arith.constant dense<0.000000e+00> : vector<1xf32>
      %40 = vector.multi_reduction <add>, %39, %cst_25 [1] : vector<1x256xf32> to vector<1xf32>
      %41 = vector.shape_cast %40 : vector<1xf32> to vector<1x1xf32>
      %42 = vector.shape_cast %41 : vector<1x1xf32> to vector<1x1x1xf32>
      %c0_26 = arith.constant 0 : index
      %c0_27 = arith.constant 0 : index
      %c0_28 = arith.constant 0 : index
      %43 = vector.load %arg4[%c0_26, %c0_27, %c0_28] : memref<1x1x1xf32, #tpu.memory_space<vmem>>, vector<1x1x1xf32>
      tpu.vector_store %arg4[%c0_26, %c0_27, %c0_28], %42 {strides = array<i32>} : memref<1x1x1xf32, #tpu.memory_space<vmem>>, vector<1x1x1xf32>,
    } else {
    }
    return
  }
  func.func @transform_0(%arg0: i32, %arg1: i32) -> (i32, i32, i32) {
    %c0_i32 = arith.constant 0 : i32
    %c0_i32_0 = arith.constant 0 : i32
    return %arg0, %arg1, %c0_i32 : i32, i32, i32
  }
  func.func @transform_1(%arg0: i32, %arg1: i32) -> (i32, i32, i32) {
    %c0_i32 = arith.constant 0 : i32
    %c0_i32_0 = arith.constant 0 : i32
    return %arg0, %arg1, %c0_i32 : i32, i32, i32
  }
  func.func @transform_2(%arg0: i32, %arg1: i32) -> (i32, i32, i32) {
    %c0_i32 = arith.constant 0 : i32
    %c0_i32_0 = arith.constant 0 : i32
    %c0_i32_1 = arith.constant 0 : i32
    return %arg0, %c0_i32, %c0_i32_0 : i32, i32, i32
  }
}

</mosaic_0001>

<bundles_post_ra>
// kernel: tpu_custom_call.1
= control target key start
LH: loop header
LB: loop body
LE: loop exit
PB: predicated region body
PF: predicated region fallthrough
CT: control target
= control target key end

     0   :  { %7 = vsyncpa [#allocation5], 0  ;;  %s897_s0 = inlined_call_operand.hbm [shape: f32[2,4,256], index: 0, kind: input, shape index: {}]   ;;  %s898_s1 = inlined_call_operand.hbm [shape: f32[2,4,256], index: 1, kind: input, shape index: {}]   ;;  %s899_s2 = inlined_call_operand.vmem [shape: f32[2,1,1], index: 2, kind: output, shape index: {}]  }
   0x1   :  { %9 = vsyncpa [#allocation5 + $0x1], 0 }
   0x2   :  { %10 = vsyncpa [#allocation7], 0 }
   0x3   :  { %12 = vsyncpa [#allocation7 + $0x1], 0  ;;  %s749_s9 = smov 0   ;;  %s751_s10 = smov 0  }
   0x4   :  { %s753_s11 = smov 0   ;;  %s755_s12 = smov 0  }
   0x5   :  { %s757_s13 = smov 0   ;;  %s759_s14 = smov 0  }
   0x6 LB: > { %s531_s15 = sadd.s32 4294967295, %s728_s14   ;;  %s30_s16 = sadd.s32 1, %s724_s13  ;;  %s728_s14 = sphi %s759_s14, %s18_s14   ;;  %s724_s13 = sphi %s757_s13, %s910_s13   ;;  %s720_s12 = sphi %s755_s12, %s909_s12   ;;  %s716_s11 = sphi %s753_s11, %s908_s11   ;;  %s712_s10 = sphi %s751_s10, %s907_s10   ;;  %s708_s9 = sphi %s749_s9, %s906_s9  }
   0x7   : > { %p32_p0 = scmp.ge.s32.totalorder %s30_s16, 2  ;;  %s39_s17 = sadd.s32 1, %s716_s11 }
   0x8   : > { %p46_p1 = scmp.ne.s32.totalorder %s716_s11, %s712_s10  ;;  %p47_p2 = scmp.eq.s32.totalorder %s728_s14, 0 }
   0x9   : > { %s912_s16 = smov (%p32_p0, %s30_s16), 0  ;;  %p52_p4 = scmp.ne.s32.totalorder %s712_s10, %s708_s9 }
   0xa   : > { %p785_p3 = por %p47_p2, %p46_p1  ;;  %s34_s19 = ssub.s32 %s724_s13, %s912_s16 }
   0xb   : > { %p53_p5 = scmp.eq.s32.totalorder %s531_s15, 0  ;;  %p37_p6 = scmp.eq.s32.totalorder %s34_s19, 0 }
   0xc   : > { %p559_p8 = scmp.lt.s32.totalorder %s728_s14, 2  ;;  %s801_s22 = sand.u32 1, %s716_s11  }
   0xd   : > { %p792_p7 = por %p53_p5, %p52_p4  ;;  %s546_s23 = sshll.u32 %s724_s13, 7 }
   0xe   : > { %s798_s21 = scalar_select %p37_p6, %s716_s11, %s39_s17  }
   0xf   : > { %s535_s24 = sshll.u32 %s801_s22, 3  ;;  %s142_s27 = scalar_lea.hbm %s897_s0, %s546_s23 }
  0x10   : > { %s134_s28 = scalar_lea.vmem [#allocation4], %s535_s24  ;;  %p810_p9 = pnand %p559_p8, %p785_p3 }
  0x11   : > { %s144_s29 = sshll.u32 %s134_s28, 4  ;;  %p541_p10 = scmp.ge.s32.totalorder %s728_s14, 1  ;;  %s145_s29 = int_to_ptr.vmem [resolvable:$true] %s144_s29 }
  0x12   : > { %p170_p11 = scmp.lt.s32.totalorder %s728_s14, 3  ;;  %s131_s3 = scalar_lea.sflag [#allocation5], %s801_s22 }
  0x13   : > { %p620_p12 = pneg %p810_p9  ;;  %s631_s4 = scalar_lea.vmem %s145_s29, 128 }
  0x14   : > { %p632_p13 = scmp.ne.s32.totalorder %s145_s29, %s631_s4  ;;  %s730_s5 = smov [#allocation4]  }
  0x15   : > { %s636_s6 = sshll.u32 %s730_s5, 4  ;;  %s637_s6 = int_to_ptr.vmem [resolvable:$false] %s636_s6 }
  0x16   : > { %p634_p0 = pnand %p632_p13, %p620_p12  ;;  %s638_s7 = scalar_lea.vmem %s637_s6, 256 }
  0x17   : > { %p639_p2 = scmp.lt.s32.totalorder %s145_s29, %s637_s6  ;;  %p640_p3 = scmp.lt.s32.totalorder %s638_s7, %s631_s4 }
  0x18   : > { %p635_p1 = pneg %p634_p0 }
  0x19   : > { %p641_p4 = por %p640_p3, %p639_p2 }
  0x1b   : > { %p642_p5 = pnand %p641_p4, %p635_p1 }
  0x1d   : > { %645 = shalt.err (!%p642_p5)
}
  0x1e   : > { %555 = dma.hbm_to_vmem [thread:$0]  (!%p810_p9), %s142_s27, 128, %s145_s29, %s131_s3  }
  0x1f   : > { %p828_p6 = pnand %p541_p10, %p170_p11  ;;  %s163_s17 = scalar_lea.hbm %s898_s1, %s546_s23 }
  0x20   : > { %s155_s18 = scalar_lea.vmem [#allocation6], %s535_s24  ;;  %s152_s25 = scalar_lea.sflag [#allocation7], %s801_s22 }
  0x21   : > { %s165_s19 = sshll.u32 %s155_s18, 4  ;;  %s731_s27 = smov [#allocation6]   ;;  %s166_s19 = int_to_ptr.vmem [resolvable:$true] %s165_s19 }
  0x22   : > { %s659_s26 = scalar_lea.vmem %s166_s19, 128  ;;  %s664_s28 = sshll.u32 %s731_s27, 4  ;;  %s665_s28 = int_to_ptr.vmem [resolvable:$false] %s664_s28 }
  0x23   : > { %p660_p8 = scmp.ne.s32.totalorder %s166_s19, %s659_s26  ;;  %s666_s29 = scalar_lea.vmem %s665_s28, 256 }
  0x24   : > { %p667_p10 = scmp.lt.s32.totalorder %s166_s19, %s665_s28  ;;  %p668_p11 = scmp.lt.s32.totalorder %s666_s29, %s659_s26 }
  0x25   : > { %p662_p13 = pnand %p660_p8, %p620_p12 }
  0x26   : > { %p669_p1 = por %p668_p11, %p667_p10 }
  0x27   : > { %p663_p0 = pneg %p662_p13 }
  0x29   : > { %p670_p2 = pnand %p669_p1, %p663_p0 }
  0x2b   : > { %673 = shalt.err (!%p670_p2)
}
  0x2c   : > { %558 = dma.hbm_to_vmem [thread:$0]  (!%p810_p9), %s163_s17, 128, %s166_s19, %s152_s25  }
  0x2d   : > { %174 = sbr.rel (%p828_p6) target bundleno = 563 (0x233), region = 28  ;;  %s176_s22 = sand.u32 (!%p828_p6), 1, %s712_s10  }
  0x2e   : > { %s542_s23 = sshll.u32 (!%p828_p6), %s176_s22, 3  ;;  %s177_s24 = scalar_lea.sflag (!%p828_p6), [#allocation5], %s176_s22 }
  0x2f   : > { %s180_s3 = scalar_lea.vmem (!%p828_p6), [#allocation4], %s542_s23 }
  0x32   : > { %699 = dma.done.wait (%p792_p7), %s177_s24, 128  }
  0x33   : > { %701 = vsyncadd (%p792_p7), %s177_s24, 4294967168  ;;  %s186_s4 = scalar_lea.sflag [#allocation7], %s176_s22  ;;  %s189_s5 = scalar_lea.vmem [#allocation6], %s542_s23 }
  0x34   : > { %703 = dma.done.wait (%p792_p7), %s186_s4, 128  }
  0x35   : > { %705 = vsyncadd (%p792_p7), %s186_s4, 4294967168  ;;  %v220_v0 = vlaneseq  ;;  %v732_v2 = vmov 0.0   ;;  %v226_v3 = vld [vmem:[%s180_s3] sm:$0xff]  ;;  %v227_v4 = vld [vmem:[%s189_s5] sm:$0xff]  ;;  %vm233_vm1 = vcmask 1043456   ;;  %vm326_vm2 = vcmask 1040384  }
  0x36   : > { %v229_v5 = vmul.f32 %v226_v3, %v226_v3  ;;  %v273_v6 = vmul.f32 %v227_v4, %v227_v4  ;;  %v733_v19 = vmov 1966171168   ;;  %p213_p7 = scmp.lt.s32.totalorder %s720_s12, 1  ;;  %vm433_vm3 = vcmask 0  }
  0x37   : > { %vm852_vm0 = vcmp.lt.s32.totalorder %v220_v0, 256  ;;  %v252_v20 = vunpack.c.l.s4 %v733_v19  ;;  %v255_v30 = vshrl.u32 %v220_v0, 7 }
  0x38   : > { %224 = vst.msk [vmem:[#allocation2] sm:$0x3] %vm852_vm0, %v732_v2  ;;  %225 = vst.msk [vmem:[#allocation3] sm:$0x3] %vm852_vm0, %v732_v2  ;;  %v231_v7 = vcombine.high %v229_v5, %v229_v5  ;;  %v234_v8 = vsel %vm233_vm1, %v229_v5, 0.0  ;;  %v275_v9 = vcombine.high %v273_v6, %v273_v6  ;;  %v277_v10 = vsel %vm233_vm1, %v273_v6, 0.0 }
  0x39   : > { %v235_v11 = vrot.slane %v234_v8, 4  ;;  %v278_v12 = vrot.slane %v277_v10, 4  ;;  %v253_v29 = vunpack.c.0.s8 %v252_v20  ;;  %v318_v52 = vsub.s32 0, %v255_v30  ;;  %s914_s12 = smov (!%p213_p7, %s720_s12), 1 }
  0x3a   : > { %v241_v13 = vsel %vm233_vm1, %v231_v7, 0.0  ;;  %v284_v14 = vsel %vm233_vm1, %v275_v9, 0.0  ;;  %v322_v53 = vsub.s32 1, %v255_v30  ;;  %s215_s6 = scalar_lea.vmem %s899_s2, %s914_s12 }
  0x3b   : > { %v236_v15 = vadd.f32 %v235_v11, %v234_v8  ;;  %v242_v16 = vrot.slane %v241_v13, 4  ;;  %v279_v17 = vadd.f32 %v278_v12, %v277_v10  ;;  %v285_v18 = vrot.slane %v284_v14, 4 }
  0x3c   : > { %v256_v40 = vsub.s32 %v253_v29, %v255_v30 }
  0x3d   : > { %v237_v21 = vrot.slane %v236_v15, 2  ;;  %v243_v22 = vadd.f32 %v242_v16, %v241_v13  ;;  %v280_v23 = vrot.slane %v279_v17, 2  ;;  %v286_v24 = vadd.f32 %v285_v18, %v284_v14 }
  0x3f   : > { %v238_v25 = vadd.f32 %v237_v21, %v236_v15  ;;  %v244_v26 = vrot.slane %v243_v22, 2  ;;  %v281_v27 = vadd.f32 %v280_v23, %v279_v17  ;;  %v287_v28 = vrot.slane %v286_v24, 2  ;;  %v228_v46 = vld [vmem:[#allocation2] sm:$0x3]  ;;  %v272_v47 = vld [vmem:[#allocation3] sm:$0x3] }
  0x41   : > { %v239_v31 = vrot.slane %v238_v25, 1  ;;  %v245_v32 = vadd.f32 %v244_v26, %v243_v22  ;;  %v282_v33 = vrot.slane %v281_v27, 1  ;;  %v288_v34 = vadd.f32 %v287_v28, %v286_v24 }
  0x43   : > { %v240_v35 = vadd.f32 %v239_v31, %v238_v25  ;;  %v246_v36 = vrot.slane %v245_v32, 1  ;;  %v283_v37 = vadd.f32 %v282_v33, %v281_v27  ;;  %v289_v38 = vrot.slane %v288_v34, 1 }
  0x45   : > { %v247_v39 = vadd.f32 %v246_v36, %v245_v32  ;;  %v290_v41 = vadd.f32 %v289_v38, %v288_v34 }
  0x47   : > { %v250_v42 = vcombine.low %v240_v35, %v247_v39  ;;  %v293_v43 = vcombine.low %v283_v37, %v290_v41 }
  0x49   : > { %v257_v44 = vrot.slane %v250_v42, %v256_v40  ;;  %v300_v45 = vrot.slane %v293_v43, %v256_v40 }
  0x4b   : > { %v264_v48 = vrot.slane %v257_v44, %v256_v40  ;;  %v307_v49 = vrot.slane %v300_v45, %v256_v40 }
  0x4d   : > { %v266_v50 = vadd.f32 %v264_v48, %v228_v46  ;;  %v309_v51 = vadd.f32 %v307_v49, %v272_v47 }
  0x4f   : > { %271 = vst.msk [vmem:[#allocation2] sm:$0x3] %vm852_vm0, %v266_v50  ;;  %310 = vst.msk [vmem:[#allocation3] sm:$0x3] %vm852_vm0, %v309_v51 }
  0x56   : > { %v314_v54 = vld [vmem:[#allocation2] sm:$0x3]  ;;  %v365_v55 = vld [vmem:[#allocation3] sm:$0x3] }
  0x57   : > { %v319_v56 = vrot.slane %v314_v54, %v318_v52  ;;  %v323_v57 = vrot.slane %v314_v54, %v322_v53  ;;  %v370_v58 = vrot.slane %v365_v55, %v318_v52  ;;  %v374_v59 = vrot.slane %v365_v55, %v322_v53 }
  0x59   : > { %v327_v60 = vsel %vm326_vm2, %v319_v56, -inf  ;;  %v328_v61 = vsel %vm326_vm2, %v323_v57, -inf  ;;  %v377_v62 = vsel %vm326_vm2, %v370_v58, -inf  ;;  %v378_v63 = vsel %vm326_vm2, %v374_v59, -inf }
  0x5a   : > { %v329_v0 = vmax.f32 %v327_v60, %v328_v61  ;;  %v379_v1 = vmax.f32 %v377_v62, %v378_v63 }
  0x5c   : > { %330 = vmax.xlane.f32.xlu0 %v329_v0 }
  0x60   : > { %380 = vmax.xlane.f32.xlu0 %v379_v1 }
  0xe5   : > { %v331_v2 = vpop.xlane.xlu0 %330 }
  0xe6   : > { %v336_v3 = vrot.slane %v331_v2, %v318_v52 }
  0xe8   : > { %v338_v4 = vsub.f32 %v314_v54, %v336_v3 }
  0xe9   : > { %v381_v5 = vpop.xlane.xlu0 %380 }
  0xea   : > { %v339_v6 = vmul.f32 1.442695, %v338_v4  ;;  %v386_v7 = vrot.slane %v381_v5, %v318_v52 }
  0xec   : > { %610 = vpow2.f32 %v339_v6  ;;  %v388_v8 = vsub.f32 %v365_v55, %v386_v7 }
  0xee   : > { %v389_v9 = vmul.f32 1.442695, %v388_v8 }
  0xf0   : > { %612 = vpow2.f32 %v389_v9 }
  0xf9   : > { %v611_v10 = vpop.eup %610 }
  0xfa   : > { %v345_v11 = vrot.slane %v611_v10, %v318_v52  ;;  %v349_v12 = vrot.slane %v611_v10, %v322_v53 }
  0xfc   : > { %v352_v13 = vsel %vm326_vm2, %v345_v11, 0.0  ;;  %v353_v14 = vsel %vm326_vm2, %v349_v12, 0.0 }
  0xfd   : > { %v613_v15 = vpop.eup %612  ;;  %v354_v16 = vadd.f32 %v353_v14, %v352_v13 }
  0xfe   : > { %v395_v17 = vrot.slane %v613_v15, %v318_v52  ;;  %v399_v18 = vrot.slane %v613_v15, %v322_v53 }
  0xff   : > { %355 = vadd.xlane.f32.xlu1 %v354_v16 }
 0x100   : > { %v402_v19 = vsel %vm326_vm2, %v395_v17, 0.0  ;;  %v403_v20 = vsel %vm326_vm2, %v399_v18, 0.0 }
 0x101   : > { %v404_v21 = vadd.f32 %v403_v20, %v402_v19 }
 0x103   : > { %405 = vadd.xlane.f32.xlu1 %v404_v21 }
 0x188   : > { %v356_v22 = vpop.xlane.xlu1 %355 }
 0x189   : > { %v361_v23 = vrot.slane %v356_v22, %v318_v52 }
 0x18b   : > { %614 = vrcp.f32 %v361_v23 }
 0x18c   : > { %v406_v24 = vpop.xlane.xlu1 %405 }
 0x18d   : > { %v411_v25 = vrot.slane %v406_v24, %v318_v52 }
 0x18f   : > { %616 = vrcp.f32 %v411_v25 }
 0x198   : > { %v615_v26 = vpop.eup %614 }
 0x199   : > { %v364_v28 = vmul.f32 %v615_v26, %v611_v10 }
 0x19c   : > { %v617_v27 = vpop.eup %616 }
 0x19d   : > { %v414_v29 = vmul.f32 %v617_v27, %v613_v15 }
 0x19f   : > { %v415_v30 = vsub.f32 %v364_v28, %v414_v29 }
 0x1a1   : > { %v416_v31 = vmul.f32 %v415_v30, %v415_v30 }
 0x1a3   : > { %v421_v32 = vrot.slane %v416_v31, %v318_v52  ;;  %v425_v33 = vrot.slane %v416_v31, %v322_v53 }
 0x1a5   : > { %v428_v34 = vsel %vm326_vm2, %v421_v32, 0.0  ;;  %v429_v35 = vsel %vm326_vm2, %v425_v33, 0.0 }
 0x1a6   : > { %v430_v36 = vadd.f32 %v429_v35, %v428_v34 }
 0x1a8   : > { %431 = vadd.xlane.f32.xlu0 %v430_v36 }
 0x231   : > { %v432_v37 = vpop.xlane.xlu0 %431 }
 0x232   : > { %434 = vst.msk [vmem:[%s215_s6] sm:$0x1] %vm433_vm3, %v432_v37 }
 0x233 PF: > { %s18_s14 = sadd.s32 1, %s728_s14   ;;  %s906_s9 = smov %s712_s10 }
 0x234   : > { %p15_p9 = scmp.ge.s32.totalorder %s18_s14, 4   ;;  %s907_s10 = smov %s716_s11 }
 0x235   : > { %s908_s11 = smov %s798_s21  ;;  %s909_s12 = smov %s724_s13 }
 0x236   : > { %s910_s13 = smov %s912_s16  ;;  %17 = sbr.rel (!%p15_p9) target bundleno = 6 (0x6), region = 89 }
 0x23b   :  { %452 = vsyncpa [#allocation5], 1 }
 0x23c   :  { %454 = vsyncpa [#allocation5 + $0x1], 1 }
 0x23d   :  { %455 = vsyncpa [#allocation7], 1 }
 0x23e   :  { %457 = vsyncpa [#allocation7 + $0x1], 1 }

</bundles_post_ra>
